<compile_context>
chip_gen: v7x
topology: tpu7x:2x2x1
jax: 0.10.0
libtpu: 0.0.40
codegen_flags: <defaults>
</compile_context>

<pallas_src>
import functools
import math

import jax
import jax.numpy as jnp
from jax.experimental import pallas as pl
from jax.experimental.pallas import tpu as pltpu


_LN_EPS = 1e-5        # PyTorch nn.LayerNorm default
_HEAD_GROUP = 8       # tokens folded per lane-dense head-projection row


# ----------------------------- helpers --------------------------------------

def _gelu(x):
    # exact (erf) GELU — matches torch.nn.GELU() default.
    return 0.5 * x * (1.0 + jax.lax.erf(x * 0.7071067811865476))


def _row_tile(m, cap=512):
    """Row tile: full extent when small, else a large multiple-of-8 tile."""
    return m if m <= cap else cap


_VMEM_LIMIT_CACHE = [None]


def _vmem_limit_bytes():
    if _VMEM_LIMIT_CACHE[0] is None:
        try:
            cap = int(pltpu.get_tpu_info().vmem_capacity_bytes)
        except Exception:
            cap = 64 * 1024 * 1024          # conservative (v7x per-core VMEM)
        _VMEM_LIMIT_CACHE[0] = min((cap * 3) // 4, 96 * 1024 * 1024)
    return _VMEM_LIMIT_CACHE[0]


def _cparams(n_parallel_axes):
    return pltpu.CompilerParams(
        dimension_semantics=("parallel",) * n_parallel_axes,
        vmem_limit_bytes=_vmem_limit_bytes(),
    )


# ----------------------------- Pallas kernels --------------------------------

def _embed_kernel(p_ref, w_ref, add_ref, t_ref, g_ref, b_ref, o_ref, *, eps, cd):
    """patch-linear + (bias + var_embed + pos_embed) + LayerNorm + time-embed add."""
    p = p_ref[0].astype(cd)                                     # (tl, pp)
    y = jnp.dot(p, w_ref[...], preferred_element_type=jnp.float32)
    y = y + add_ref[...]                                        # bias + var + pos
    mu = jnp.mean(y, axis=-1, keepdims=True)
    yc = y - mu
    var = jnp.mean(yc * yc, axis=-1, keepdims=True)
    yn = yc * jax.lax.rsqrt(var + eps)
    out = yn * g_ref[...] + b_ref[...] + t_ref[0]               # + per-batch t_emb
    o_ref[0] = out.astype(o_ref.dtype)


def embed_norm_time(patches, patch_w, add_emb, t_emb, gamma, beta, *, compute_dtype):
    B, L, PP = patches.shape
    D = patch_w.shape[1]
    tl = _row_tile(L)
    return pl.pallas_call(
        functools.partial(_embed_kernel, eps=_LN_EPS, cd=compute_dtype),
        out_shape=jax.ShapeDtypeStruct((B, L, D), compute_dtype),
        grid=(B, pl.cdiv(L, tl)),
        in_specs=[
            pl.BlockSpec((1, tl, PP), lambda b, i: (b, i, 0)),
            pl.BlockSpec((PP, D), lambda b, i: (0, 0)),
            pl.BlockSpec((tl, D), lambda b, i: (i, 0)),
            pl.BlockSpec((1, 1, D), lambda b, i: (b, 0, 0)),
            pl.BlockSpec((1, D), lambda b, i: (0, 0)),
            pl.BlockSpec((1, D), lambda b, i: (0, 0)),
        ],
        out_specs=pl.BlockSpec((1, tl, D), lambda b, i: (b, i, 0)),
        compiler_params=_cparams(2),
    )(patches, patch_w, add_emb, t_emb, gamma, beta)


def _layer_kernel(x_ref, wq_ref, wk_ref, wv_ref, bq_ref, bk_ref, bv_ref,
                  wo_ref, bo_ref, g1_ref, be1_ref,
                  w1_ref, bf1_ref, w2_ref, bf2_ref, g2_ref, be2_ref,
                  o_ref, *, num_heads, scale, eps, cd):
    """One fused post-norm TransformerEncoderLayer for a single batch element."""
    x = x_ref[0]                                 # (L, D), compute dtype
    xc = x.astype(cd)
    x32 = x.astype(jnp.float32)                  # residual kept in f32
    D = x.shape[-1]
    dh = D // num_heads

    # ---- QKV projections (f32 accumulation) ----
    q = jnp.dot(xc, wq_ref[...], preferred_element_type=jnp.float32) + bq_ref[...]
    k = jnp.dot(xc, wk_ref[...], preferred_element_type=jnp.float32) + bk_ref[...]
    v = jnp.dot(xc, wv_ref[...], preferred_element_type=jnp.float32) + bv_ref[...]

    # ---- multi-head attention (static head unroll, all in VMEM) ----
    # TODO(synk): for large L (real weather resolutions) switch to a
    # flash-style KV-tiled kernel; at these shapes full (L,L) scores fit VMEM.
    heads = []
    for h in range(num_heads):
        lo = h * dh
        qh = (q[:, lo:lo + dh] * scale).astype(cd)     # fold scale into q (L,dh)
        kh = k[:, lo:lo + dh].astype(cd)
        vh = v[:, lo:lo + dh].astype(cd)
        s = jax.lax.dot_general(qh, kh, (((1,), (1,)), ((), ())),
                                preferred_element_type=jnp.float32)  # (L, L)
        m = jnp.max(s, axis=-1, keepdims=True)
        p = jnp.exp(s - m)
        denom = jnp.sum(p, axis=-1, keepdims=True)
        oh = jnp.dot(p.astype(cd), vh, preferred_element_type=jnp.float32)
        heads.append(oh / denom)                       # divide (L,dh), not (L,L)
    attn = jnp.concatenate(heads, axis=-1)             # (L, D) f32, lane-dense

    # ---- out-proj + residual + LayerNorm1 ----
    y = jnp.dot(attn.astype(cd), wo_ref[...], preferred_element_type=jnp.float32)
    y = y + bo_ref[...] + x32
    mu = jnp.mean(y, axis=-1, keepdims=True)
    yc = y - mu
    var = jnp.mean(yc * yc, axis=-1, keepdims=True)
    x1 = yc * jax.lax.rsqrt(var + eps) * g1_ref[...] + be1_ref[...]   # (L, D) f32

    # ---- FFN: linear1 + GELU, linear2 + residual + LayerNorm2 ----
    h1 = jnp.dot(x1.astype(cd), w1_ref[...], preferred_element_type=jnp.float32)
    h1 = _gelu(h1 + bf1_ref[...])
    y2 = jnp.dot(h1.astype(cd), w2_ref[...], preferred_element_type=jnp.float32)
    y2 = y2 + bf2_ref[...] + x1
    mu2 = jnp.mean(y2, axis=-1, keepdims=True)
    y2c = y2 - mu2
    var2 = jnp.mean(y2c * y2c, axis=-1, keepdims=True)
    out = y2c * jax.lax.rsqrt(var2 + eps) * g2_ref[...] + be2_ref[...]
    o_ref[0] = out.astype(o_ref.dtype)


def encoder_layer(x, lp, *, num_heads, compute_dtype):
    B, L, D = x.shape
    ff = lp["w1"].shape[1]
    dh = D // num_heads

    def full2(shape):
        return pl.BlockSpec(shape, lambda b: (0, 0))

    xspec = pl.BlockSpec((1, L, D), lambda b: (b, 0, 0))
    return pl.pallas_call(
        functools.partial(_layer_kernel, num_heads=num_heads,
                          scale=1.0 / math.sqrt(dh), eps=_LN_EPS, cd=compute_dtype),
        out_shape=jax.ShapeDtypeStruct((B, L, D), x.dtype),
        grid=(B,),
        in_specs=[
            xspec,
            full2((D, D)), full2((D, D)), full2((D, D)),          # wq wk wv
            full2((1, D)), full2((1, D)), full2((1, D)),          # bq bk bv
            full2((D, D)), full2((1, D)),                         # wo bo
            full2((1, D)), full2((1, D)),                         # ln1 g/b
            full2((D, ff)), full2((1, ff)),                       # w1 b1
            full2((ff, D)), full2((1, D)),                        # w2 b2
            full2((1, D)), full2((1, D)),                         # ln2 g/b
        ],
        out_specs=xspec,
        compiler_params=_cparams(1),
    )(x, lp["wq"], lp["wk"], lp["wv"], lp["bq"], lp["bk"], lp["bv"],
      lp["wo"], lp["bo"], lp["ln1_g"], lp["ln1_b"],
      lp["w1"], lp["b1"], lp["w2"], lp["b2"], lp["ln2_g"], lp["ln2_b"])


def _head_linear_kernel(x_ref, w_ref, b_ref, o_ref, *, cd):
    x = x_ref[...].astype(cd)
    y = jnp.dot(x, w_ref[...], preferred_element_type=jnp.float32) + b_ref[...]
    o_ref[...] = y.astype(o_ref.dtype)


def head_linear(x, w, b, *, compute_dtype):
    """Row-tiled x:(M,K) @ w:(K,N) + b, f32 output."""
    M, K = x.shape
    N = w.shape[1]
    tm = _row_tile(M)
    return pl.pallas_call(
        functools.partial(_head_linear_kernel, cd=compute_dtype),
        out_shape=jax.ShapeDtypeStruct((M, N), jnp.float32),
        grid=(pl.cdiv(M, tm),),
        in_specs=[
            pl.BlockSpec((tm, K), lambda i: (i, 0)),
            pl.BlockSpec((K, N), lambda i: (0, 0)),
            pl.BlockSpec((1, N), lambda i: (0, 0)),
        ],
        out_specs=pl.BlockSpec((tm, N), lambda i: (i, 0)),
        compiler_params=_cparams(1),
    )(x, w, b)


# ----------------------------- model ------------------------------------------


class PallasSimpleWeatherTransformer:
    """JAX/Pallas re-implementation of SimpleWeatherTransformer (eval mode)."""

    def __init__(self, variables, img_size, patch_size=4, embed_dim=256,
                 depth=6, num_heads=8, mlp_ratio=4.0, key=None,
                 compute_dtype=jnp.bfloat16):
        self.variables = list(variables)
        self.img_size = tuple(img_size)
        self.patch_size = patch_size
        self.embed_dim = embed_dim
        self.depth = depth
        self.num_heads = num_heads
        self.ff_dim = int(embed_dim * mlp_ratio)
        self.compute_dtype = compute_dtype   # MXU operand / activation storage dtype

        V = len(self.variables)
        p = patch_size
        D = embed_dim
        pp = p * p
        ff = self.ff_dim
        Gh, Gw = self.img_size[0] // p, self.img_size[1] // p
        L = V * Gh * Gw
        cd = compute_dtype

        key = jax.random.PRNGKey(0) if key is None else key

        def trunc(k, shape, std=0.02):
            return (jax.random.truncated_normal(k, -2.0, 2.0, shape, jnp.float32)
                    * std)

        keys = iter(jax.random.split(key, 8 + depth * 8))
        prm = {}
        # TODO(synk): WeatherEmbeddingLite source was not provided — approximated
        # as a shared per-variable patch linear (p*p -> D, i.e. Conv2d(1,D,p,p))
        # plus learned variable and positional embeddings.
        patch_b = jnp.zeros((D,), jnp.float32)
        var_embed = trunc(next(keys), (V, D))
        pos_embed = trunc(next(keys), (Gh * Gw, D))
        prm["patch_w"] = trunc(next(keys), (pp, D)).astype(cd)       # pre-cast
        prm["ne_g"] = jnp.ones((1, D), jnp.float32)
        prm["ne_b"] = jnp.zeros((1, D), jnp.float32)
        prm["time_w"] = trunc(next(keys), (1, D))
        prm["time_b"] = jnp.zeros((1, D), jnp.float32)
        head_w_f32 = trunc(next(keys), (D, pp))
        head_b_f32 = jnp.zeros((pp,), jnp.float32)
        prm["head_w"] = head_w_f32.astype(cd)
        prm["head_b"] = head_b_f32.reshape(1, pp)

        layers = []
        for _ in range(depth):
            lp = {
                "wq": trunc(next(keys), (D, D)).astype(cd),
                "wk": trunc(next(keys), (D, D)).astype(cd),
                "wv": trunc(next(keys), (D, D)).astype(cd),
                "bq": jnp.zeros((1, D), jnp.float32),
                "bk": jnp.zeros((1, D), jnp.float32),
                "bv": jnp.zeros((1, D), jnp.float32),
                "wo": trunc(next(keys), (D, D)).astype(cd),
                "bo": jnp.zeros((1, D), jnp.float32),
                "ln1_g": jnp.ones((1, D), jnp.float32),
                "ln1_b": jnp.zeros((1, D), jnp.float32),
                "w1": trunc(next(keys), (D, ff)).astype(cd),
                "b1": jnp.zeros((1, ff), jnp.float32),
                "w2": trunc(next(keys), (ff, D)).astype(cd),
                "b2": jnp.zeros((1, D), jnp.float32),
                "ln2_g": jnp.ones((1, D), jnp.float32),
                "ln2_b": jnp.zeros((1, D), jnp.float32),
            }
            layers.append(lp)
        self.params = prm
        self.layers = layers

        # Precomputed fused additive embedding: patch bias + var_embed + pos_embed
        # in token order (v, gh, gw).  Shape (L, D), kept f32 (added post-accum).
        self.add_emb = ((var_embed[:, None, :] + pos_embed[None, :, :])
                        .reshape(L, D) + patch_b[None, :])

        # Lane-dense head projection: fold _HEAD_GROUP tokens per output row via a
        # block-diagonal weight so the kernel stores 128-wide rows instead of
        # masked pp(=16)-wide rows.  Stored in compute dtype (bf16) per review.
        G = _HEAD_GROUP
        w_g = jnp.zeros((G * D, G * pp), jnp.float32)
        for j in range(G):
            w_g = w_g.at[j * D:(j + 1) * D, j * pp:(j + 1) * pp].set(head_w_f32)
        self.head_w_grouped = w_g.astype(cd)
        self.head_b_grouped = jnp.tile(head_b_f32, G).reshape(1, G * pp)

    def forward(self, x, variables, time_interval):
        # x: (B, V, H, W) float32; time_interval: (B,) float32
        del variables  # variable identity handled via fixed var_embed ordering
        prm = self.params
        B, V, Himg, Wimg = x.shape
        p = self.patch_size
        pp = p * p
        D = self.embed_dim
        Gh, Gw = Himg // p, Wimg // p
        L = V * Gh * Gw
        M = B * L
        cd = self.compute_dtype

        # ---- patchify (plain-JAX gather; mirrors unpatchify permutation) ----
        patches = (x.reshape(B, V, Gh, p, Gw, p)
                     .transpose(0, 1, 2, 4, 3, 5)
                     .reshape(B, L, pp)).astype(jnp.float32)

        # ---- timestep embedding: Linear(1, D) + GELU (tiny; plain JAX) ----
        t = time_interval.reshape(B, 1).astype(jnp.float32)
        t_emb = _gelu(t * prm["time_w"] + prm["time_b"]).reshape(B, 1, D)

        # ---- fused: patch linear + embeds + norm_embed LN + time add ----
        xt = embed_norm_time(patches, prm["patch_w"], self.add_emb, t_emb,
                             prm["ne_g"], prm["ne_b"], compute_dtype=cd)

        # ---- transformer encoder: one fused pallas_call per layer ----
        # TODO(synk): dropout omitted (eval-mode identity).
        for lp in self.layers:
            xt = encoder_layer(xt, lp, num_heads=self.num_heads, compute_dtype=cd)

        # ---- head projection (lane-dense grouped path when M % 8 == 0) ----
        G = _HEAD_GROUP
        x2d = xt.reshape(M, D)
        if M % G == 0:
            out = head_linear(x2d.reshape(M // G, G * D),
                              self.head_w_grouped, self.head_b_grouped,
                              compute_dtype=cd)
        else:
            out = head_linear(x2d, prm["head_w"], prm["head_b"], compute_dtype=cd)
        out = out.reshape(B, L, pp)

        # ---- unpatchify ----
        out = (out.reshape(B, V, Gh, Gw, p, p)
                  .transpose(0, 1, 2, 4, 3, 5)
                  .reshape(B, V, Himg, Wimg))
        return out


# ----------------------------- main -------------------------------------------

if __name__ == "__main__":
    key = jax.random.PRNGKey(0)
    k_x, k_t, k_w = jax.random.split(key, 3)

    variables = ["t2m", "u10", "v10", "z500"]          # V = 4
    img_size = (16, 16)
    patch_size = 4                                      # Gh = Gw = 4, L = 64
    model = PallasSimpleWeatherTransformer(
        variables=variables, img_size=img_size, patch_size=patch_size,
        embed_dim=32, depth=2, num_heads=4, mlp_ratio=4.0, key=k_w)

    B = 2
    x = jax.random.normal(k_x, (B, len(variables), *img_size), jnp.float32)
    time_interval = jax.random.uniform(k_t, (B,), jnp.float32) * 6.0

    out = model.forward(x, variables, time_interval)
    out = jax.block_until_ready(out)

    assert out.shape == (B, len(variables), *img_size), out.shape
    assert bool(jnp.all(jnp.isfinite(out)))
    print("KERNEL_OK")
</pallas_src>

<mosaic_0001>
module attributes {stable_mosaic.version = 11 : i64} {
  func.func @_embed_kernel(%arg0: i32, %arg1: i32, %arg2: memref<1x64x16xf32, #tpu.memory_space<vmem>>, %arg3: memref<16x32xbf16, #tpu.memory_space<vmem>>, %arg4: memref<64x32xf32, #tpu.memory_space<vmem>>, %arg5: memref<1x1x32xf32, #tpu.memory_space<vmem>>, %arg6: memref<1x32xf32, #tpu.memory_space<vmem>>, %arg7: memref<1x32xf32, #tpu.memory_space<vmem>>, %arg8: memref<1x64x32xbf16, #tpu.memory_space<vmem>>) attributes {dimension_semantics = [#tpu.dimension_semantics<parallel>, #tpu.dimension_semantics<parallel>], iteration_bounds = array<i64: 2, 1>, scalar_prefetch = 0 : i64, scratch_operands = 0 : i64, tpu.core_type = #tpu.core_type<tc>, window_params = [{transform_indices = @transform_0, window_bounds = array<i64: 1, 64, 16>}, {pipeline_mode = #tpu.pipeline_mode<synchronous>, transform_indices = @transform_1, window_bounds = array<i64: 16, 32>}, {transform_indices = @transform_2, window_bounds = array<i64: 64, 32>}, {transform_indices = @transform_3, window_bounds = array<i64: 1, 1, 32>}, {pipeline_mode = #tpu.pipeline_mode<synchronous>, transform_indices = @transform_4, window_bounds = array<i64: 1, 32>}, {pipeline_mode = #tpu.pipeline_mode<synchronous>, transform_indices = @transform_5, window_bounds = array<i64: 1, 32>}, {transform_indices = @transform_6, window_bounds = array<i64: 1, 64, 32>}]} {
    %c0 = arith.constant 0 : index
    %c0_0 = arith.constant 0 : index
    %c0_1 = arith.constant 0 : index
    %0 = vector.load %arg2[%c0, %c0_0, %c0_1] : memref<1x64x16xf32, #tpu.memory_space<vmem>>, vector<1x64x16xf32>
    %1 = vector.shape_cast %0 : vector<1x64x16xf32> to vector<64x16xf32>
    %2 = arith.truncf %1 : vector<64x16xf32> to vector<64x16xbf16>
    %c0_2 = arith.constant 0 : index
    %c0_3 = arith.constant 0 : index
    %3 = vector.load %arg3[%c0_2, %c0_3] : memref<16x32xbf16, #tpu.memory_space<vmem>>, vector<16x32xbf16>
    %cst = arith.constant dense<0.000000e+00> : vector<64x32xf32>
    %4 = tpu.matmul %2, %3, %cst {dimension_numbers = #tpu.dot_dimension_numbers<[1], [0], [0], [1], [0, 0, 1, 1], [], []>} : vector<64x16xbf16>, vector<16x32xbf16>, vector<64x32xf32> -> vector<64x32xf32>
    %c0_4 = arith.constant 0 : index
    %c0_5 = arith.constant 0 : index
    %5 = vector.load %arg4[%c0_4, %c0_5] : memref<64x32xf32, #tpu.memory_space<vmem>>, vector<64x32xf32>
    %6 = arith.addf %4, %5 : vector<64x32xf32>
    %cst_6 = arith.constant dense<0.000000e+00> : vector<64xf32>
    %7 = vector.multi_reduction <add>, %6, %cst_6 [1] : vector<64x32xf32> to vector<64xf32>
    %8 = vector.shape_cast %7 : vector<64xf32> to vector<64x1xf32>
    %cst_7 = arith.constant 3.200000e+01 : f32
    %9 = vector.broadcast %cst_7 : f32 to vector<64x1xf32>
    %10 = arith.divf %8, %9 : vector<64x1xf32>
    %11 = vector.broadcast %10 : vector<64x1xf32> to vector<64x32xf32>
    %12 = arith.subf %6, %11 : vector<64x32xf32>
    %13 = arith.mulf %12, %12 : vector<64x32xf32>
    %cst_8 = arith.constant dense<0.000000e+00> : vector<64xf32>
    %14 = vector.multi_reduction <add>, %13, %cst_8 [1] : vector<64x32xf32> to vector<64xf32>
    %15 = vector.shape_cast %14 : vector<64xf32> to vector<64x1xf32>
    %cst_9 = arith.constant 3.200000e+01 : f32
    %16 = vector.broadcast %cst_9 : f32 to vector<64x1xf32>
    %17 = arith.divf %15, %16 : vector<64x1xf32>
    %cst_10 = arith.constant 9.99999974E-6 : f32
    %18 = vector.broadcast %cst_10 : f32 to vector<64x1xf32>
    %19 = arith.addf %17, %18 : vector<64x1xf32>
    %20 = math.rsqrt %19 : vector<64x1xf32>
    %21 = vector.broadcast %20 : vector<64x1xf32> to vector<64x32xf32>
    %22 = arith.mulf %12, %21 : vector<64x32xf32>
    %c0_11 = arith.constant 0 : index
    %c0_12 = arith.constant 0 : index
    %23 = vector.load %arg6[%c0_11, %c0_12] : memref<1x32xf32, #tpu.memory_space<vmem>>, vector<1x32xf32>
    %24 = vector.broadcast %23 : vector<1x32xf32> to vector<64x32xf32>
    %25 = arith.mulf %22, %24 : vector<64x32xf32>
    %c0_13 = arith.constant 0 : index
    %c0_14 = arith.constant 0 : index
    %26 = vector.load %arg7[%c0_13, %c0_14] : memref<1x32xf32, #tpu.memory_space<vmem>>, vector<1x32xf32>
    %27 = vector.broadcast %26 : vector<1x32xf32> to vector<64x32xf32>
    %28 = arith.addf %25, %27 : vector<64x32xf32>
    %c0_15 = arith.constant 0 : index
    %c0_16 = arith.constant 0 : index
    %c0_17 = arith.constant 0 : index
    %29 = vector.load %arg5[%c0_15, %c0_16, %c0_17] : memref<1x1x32xf32, #tpu.memory_space<vmem>>, vector<1x1x32xf32>
    %30 = vector.shape_cast %29 : vector<1x1x32xf32> to vector<1x32xf32>
    %31 = vector.broadcast %30 : vector<1x32xf32> to vector<64x32xf32>
    %32 = arith.addf %28, %31 : vector<64x32xf32>
    %33 = arith.truncf %32 : vector<64x32xf32> to vector<64x32xbf16>
    %c0_18 = arith.constant 0 : index
    %c0_19 = arith.constant 0 : index
    %c0_20 = arith.constant 0 : index
    %34 = vector.load %arg8[%c0_18, %c0_19, %c0_20] : memref<1x64x32xbf16, #tpu.memory_space<vmem>>, vector<1x64x32xbf16>
    %35 = vector.shape_cast %34 : vector<1x64x32xbf16> to vector<64x32xbf16>
    %36 = vector.shape_cast %33 : vector<64x32xbf16> to vector<1x64x32xbf16>
    tpu.vector_store %arg8[%c0_18, %c0_19, %c0_20], %36 {strides = array<i32>} : memref<1x64x32xbf16, #tpu.memory_space<vmem>>, vector<1x64x32xbf16>,
    return
  }
  func.func @transform_0(%arg0: i32, %arg1: i32) -> (i32, i32, i32) {
    %c0_i32 = arith.constant 0 : i32
    %c0_i32_0 = arith.constant 0 : i32
    return %arg0, %arg1, %c0_i32 : i32, i32, i32
  }
  func.func @transform_1(%arg0: i32, %arg1: i32) -> (i32, i32) {
    %c0_i32 = arith.constant 0 : i32
    %c0_i32_0 = arith.constant 0 : i32
    %c0_i32_1 = arith.constant 0 : i32
    return %c0_i32, %c0_i32_0 : i32, i32
  }
  func.func @transform_2(%arg0: i32, %arg1: i32) -> (i32, i32) {
    %c0_i32 = arith.constant 0 : i32
    %c0_i32_0 = arith.constant 0 : i32
    return %arg1, %c0_i32 : i32, i32
  }
  func.func @transform_3(%arg0: i32, %arg1: i32) -> (i32, i32, i32) {
    %c0_i32 = arith.constant 0 : i32
    %c0_i32_0 = arith.constant 0 : i32
    %c0_i32_1 = arith.constant 0 : i32
    return %arg0, %c0_i32, %c0_i32_0 : i32, i32, i32
  }
  func.func @transform_4(%arg0: i32, %arg1: i32) -> (i32, i32) {
    %c0_i32 = arith.constant 0 : i32
    %c0_i32_0 = arith.constant 0 : i32
    %c0_i32_1 = arith.constant 0 : i32
    return %c0_i32, %c0_i32_0 : i32, i32
  }
  func.func @transform_5(%arg0: i32, %arg1: i32) -> (i32, i32) {
    %c0_i32 = arith.constant 0 : i32
    %c0_i32_0 = arith.constant 0 : i32
    %c0_i32_1 = arith.constant 0 : i32
    return %c0_i32, %c0_i32_0 : i32, i32
  }
  func.func @transform_6(%arg0: i32, %arg1: i32) -> (i32, i32, i32) {
    %c0_i32 = arith.constant 0 : i32
    %c0_i32_0 = arith.constant 0 : i32
    return %arg0, %arg1, %c0_i32 : i32, i32, i32
  }
}

</mosaic_0001>

<bundles_post_ra>
// kernel: tpu_custom_call.1
= control target key start
LH: loop header
LB: loop body
LE: loop exit
PB: predicated region body
PF: predicated region fallthrough
CT: control target
= control target key end

     0   :  { %s892_s21 = smov 0   ;;  %s894_s22 = smov 0   ;;  %s1040_s0 = inlined_call_operand.vmem [shape: f32[2,64,16], index: 0, kind: input, shape index: {}]   ;;  %s1041_s1 = inlined_call_operand.vmem [shape: bf16[16,32], index: 1, kind: input, shape index: {}]   ;;  %s1042_s2 = inlined_call_operand.vmem [shape: f32[64,32], index: 2, kind: input, shape index: {}]   ;;  %s1043_s3 = inlined_call_operand.vmem [shape: f32[2,1,32], index: 3, kind: input, shape index: {}]   ;;  %s1044_s4 = inlined_call_operand.vmem [shape: f32[1,32], index: 4, kind: input, shape index: {}]   ;;  %s1045_s5 = inlined_call_operand.vmem [shape: f32[1,32], index: 5, kind: input, shape index: {}]   ;;  %s1046_s6 = inlined_call_operand.vmem [shape: bf16[2,64,32], index: 6, kind: output, shape index: {}]  }
   0x1   :  { %s896_s23 = smov 0  }
   0x2 LB: > { %s28_s24 = sadd.s32 1, %s851_s22  ;;  %p742_p0 = scmp.ge.s32.totalorder %s855_s23, 1  ;;  %s855_s23 = sphi %s896_s23, %s16_s23   ;;  %s851_s22 = sphi %s894_s22, %s1048_s22   ;;  %s847_s21 = sphi %s892_s21, %s1047_s21  }
   0x3   : > { %p30_p1 = scmp.ge.s32.totalorder %s28_s24, 2  ;;  %p252_p2 = scmp.lt.s32.totalorder %s855_s23, 3 }
   0x5   : > { %s1050_s24 = smov (%p30_p1, %s28_s24), 0  ;;  %p253_p3 = pnand %p742_p0, %p252_p2 }
   0x6   : > { %v816_v0 = vld [vmem:[%s1041_s1] sm:$0xff] (!%p253_p3)   ;;  %p299_p4 = scmp.lt.s32.totalorder (!%p253_p3), %s847_s21, 1  ;;  %vm356_vm0 = vcmask (!%p253_p3), 130048   ;;  %v344_v13 = vld [vmem:[%s1042_s2 + $0x10] sm:$0xff] (!%p253_p3)  ;;  %v345_v16 = vld [vmem:[%s1042_s2 + $0x18] sm:$0xff] (!%p253_p3)  ;;  %vm434_vm1 = vcmask (!%p253_p3), 261120  }
   0x7   : > { %256 = sbr.rel (%p253_p3) target bundleno = 570 (0x23a), region = 44  ;;  %780 = vmatprep.subr.bf16.mxu0 (!%p253_p3), %v816_v0  ;;  %790 = vmatprep.subr.bf16.mxu1 (!%p253_p3), %v816_v0  ;;  %v342_v14 = vld [vmem:[%s1042_s2] sm:$0xff] (!%p253_p3)  ;;  %v347_v30 = vld [vmem:[%s1042_s2 + $0x28] sm:$0xff] (!%p253_p3)  ;;  %v349_v37 = vld [vmem:[%s1042_s2 + $0x38] sm:$0xff] (!%p253_p3)  ;;  %vm617_vm2 = vcmask (!%p253_p3), 257024  }
   0x8   : > { %781 = vmatpush3.bf16.msra.mxu0 (!%p253_p3), %v816_v0  ;;  %791 = vmatpush3.bf16.msra.mxu1 (!%p253_p3), %v816_v0  ;;  %v346_v17 = vld [vmem:[%s1042_s2 + $0x20] sm:$0xff] (!%p253_p3)  ;;  %v343_v32 = vld [vmem:[%s1042_s2 + $0x8] sm:$0xff] (!%p253_p3)  ;;  %v348_v38 = vld [vmem:[%s1042_s2 + $0x30] sm:$0xff] (!%p253_p3) }
   0xe   : > { %s1052_s21 = smov (!%p299_p4, %s847_s21), 1 }
   0xf   : > { %s765_s27 = sshll.u32 %s1052_s21, 6  ;;  %s316_s7 = scalar_lea.vmem %s1043_s3, %s1052_s21 }
  0x10   : > { %s306_s30 = scalar_lea.vmem %s1040_s0, %s765_s27  ;;  %s766_s10 = sshll.u32 %s1052_s21, 5 }
  0x11   : > { %v328_v1 = vld [vmem:[%s306_s30] sm:$0xff]  ;;  %v329_v2 = vld [vmem:[%s306_s30 + $0x8] sm:$0xff]  ;;  %v330_v3 = vld [vmem:[%s306_s30 + $0x10] sm:$0xff]  ;;  %s1008_s13 = scalar_lea.vmem %s1046_s6, %s766_s10 }
  0x12   : > { %v336_v4 = vpack.c.bf16 %v329_v2, %v328_v1  ;;  %v331_v5 = vld [vmem:[%s306_s30 + $0x18] sm:$0xff]  ;;  %v332_v6 = vld [vmem:[%s306_s30 + $0x20] sm:$0xff]  ;;  %v333_v7 = vld [vmem:[%s306_s30 + $0x28] sm:$0xff] }
  0x13   : > { %v337_v8 = vpack.c.bf16 %v331_v5, %v330_v3  ;;  %v338_v9 = vpack.c.bf16 %v333_v7, %v332_v6  ;;  %v334_v10 = vld [vmem:[%s306_s30 + $0x30] sm:$0xff]  ;;  %v335_v11 = vld [vmem:[%s306_s30 + $0x38] sm:$0xff] }
  0x14   : > { %782 = vmatprep.mubr.msk.bf16.mxu0 %vm356_vm0, %v336_v4  ;;  %v339_v12 = vpack.c.bf16 %v335_v11, %v334_v10 }
  0x15   : > { %783 = vmatmul.mubr.msk.bf16.vlgmr.msra.gmra.mrb[0].mxu0 %vm356_vm0, %v337_v8  ;;  %786 = vmatprep.mubr.msk.bf16.mxu1 %vm356_vm0, %v338_v9 }
  0x16   : > { %787 = vmatmul.mubr.msk.bf16.vlgmr.msra.gmra.mrb[0].mxu1 %vm356_vm0, %v339_v12 }
  0xe8   : > { %v784_v15 = vpop.f32.mrb[0].mxu0 }
  0xe9   : > { %v412_v18 = vadd.f32 %v784_v15, %v344_v13  ;;  %v403_v19 = vpop.f32.mrb[1].mxu0  ;;  %v788_v20 = vpop.f32.mrb[0].mxu1 }
  0xea   : > { %v404_v21 = vadd.f32 %v403_v19, %v342_v14  ;;  %v785_v22 = vpop.f32.mrb[2].mxu0  ;;  %v419_v23 = vpop.f32.mrb[1].mxu1  ;;  %v428_v41 = vadd.f32 %v788_v20, %v348_v38 }
  0xeb   : > { %v415_v24 = vadd.f32 %v785_v22, %v345_v16  ;;  %v420_v25 = vadd.f32 %v419_v23, %v346_v17  ;;  %v406_v26 = vpop.f32.mrb[3].mxu0  ;;  %v789_v27 = vpop.f32.mrb[2].mxu1  ;;  %v441_v28 = vsel %vm434_vm1, %v412_v18, 0.0 }
  0xec   : > { %v422_v29 = vpop.f32.mrb[3].mxu1  ;;  %442 = vadd.xlane.f32.xlu1 %v441_v28  ;;  %v435_v31 = vsel %vm434_vm1, %v404_v21, 0.0  ;;  %v407_v36 = vadd.f32 %v406_v26, %v343_v32  ;;  %v431_v39 = vadd.f32 %v789_v27, %v349_v37  ;;  %v453_v44 = vsel %vm434_vm1, %v428_v41, 0.0 }
  0xed   : > { %436 = vadd.xlane.f32.xlu0 %v435_v31  ;;  %v447_v33 = vsel %vm434_vm1, %v420_v25, 0.0  ;;  %v423_v34 = vadd.f32 %v422_v29, %v347_v30  ;;  %v444_v35 = vsel %vm434_vm1, %v415_v24, 0.0 }
  0xee   : > { %v438_v42 = vsel %vm434_vm1, %v407_v36, 0.0  ;;  %v456_v43 = vsel %vm434_vm1, %v431_v39, 0.0 }
  0xef   : > { %v450_v40 = vsel %vm434_vm1, %v423_v34, 0.0 }
  0xf0   : > { %445 = vadd.xlane.f32.xlu1 %v444_v35 }
  0xf1   : > { %448 = vadd.xlane.f32.xlu0 %v447_v33 }
  0xf4   : > { %451 = vadd.xlane.f32.xlu1 %v450_v40 }
  0xf5   : > { %439 = vadd.xlane.f32.xlu0 %v438_v42 }
  0xf8   : > { %457 = vadd.xlane.f32.xlu1 %v456_v43 }
  0xf9   : > { %454 = vadd.xlane.f32.xlu0 %v453_v44 }
 0x179   : > { %v443_v45 = vpop.xlane.xlu1 %442 }
 0x17a   : > { %v462_v46 = vmul.f32 0.03125, %v443_v45  ;;  %v437_v47 = vpop.xlane.xlu0 %436  ;;  %v753_v45 = vld [vmem:[%s1045_s5] ss:$0 sm:$0xff] }
 0x17b   : > { %v460_v48 = vmul.f32 0.03125, %v437_v47 }
 0x17c   : > { %v951_v49 = vsub.f32 %v412_v18, %v462_v46 }
 0x17d   : > { %v953_v50 = vsub.f32 %v404_v21, %v460_v48  ;;  %v446_v51 = vpop.xlane.xlu1 %445 }
 0x17e   : > { %v463_v52 = vmul.f32 0.03125, %v446_v51  ;;  %v449_v53 = vpop.xlane.xlu0 %448  ;;  %v478_v54 = vmul.f32 %v951_v49, %v951_v49 }
 0x17f   : > { %v464_v55 = vmul.f32 0.03125, %v449_v53  ;;  %v476_v58 = vmul.f32 %v953_v50, %v953_v50 }
 0x180   : > { %v957_v56 = vsub.f32 %v415_v24, %v463_v52  ;;  %v490_v57 = vsel %vm434_vm1, %v478_v54, 0.0  ;;  %v754_v52 = vld [vmem:[%s316_s7] ss:$0 sm:$0xff] }
 0x181   : > { %v962_v59 = vsub.f32 %v420_v25, %v464_v55  ;;  %v452_v60 = vpop.xlane.xlu1 %451  ;;  %491 = vadd.xlane.f32.xlu0 %v490_v57  ;;  %v484_v2 = vsel %vm434_vm1, %v476_v58, 0.0 }
 0x182   : > { %v465_v61 = vmul.f32 0.03125, %v452_v60  ;;  %v440_v62 = vpop.xlane.xlu0 %439  ;;  %v479_v63 = vmul.f32 %v957_v56, %v957_v56 }
 0x183   : > { %v461_v0 = vmul.f32 0.03125, %v440_v62  ;;  %v480_v3 = vmul.f32 %v962_v59, %v962_v59 }
 0x184   : > { %v493_v1 = vsel %vm434_vm1, %v479_v63, 0.0  ;;  %v970_v4 = vsub.f32 %v423_v34, %v465_v61 }
 0x185   : > { %v972_v5 = vsub.f32 %v407_v36, %v461_v0  ;;  %494 = vadd.xlane.f32.xlu1 %v493_v1  ;;  %v458_v6 = vpop.xlane.xlu1 %457  ;;  %485 = vadd.xlane.f32.xlu0 %v484_v2  ;;  %v496_v11 = vsel %vm434_vm1, %v480_v3, 0.0 }
 0x186   : > { %v467_v7 = vmul.f32 0.03125, %v458_v6  ;;  %v455_v8 = vpop.xlane.xlu0 %454  ;;  %v481_v15 = vmul.f32 %v970_v4, %v970_v4 }
 0x187   : > { %v466_v9 = vmul.f32 0.03125, %v455_v8  ;;  %v477_v10 = vmul.f32 %v972_v5, %v972_v5 }
 0x188   : > { %v977_v12 = vsub.f32 %v431_v39, %v467_v7  ;;  %v499_v17 = vsel %vm434_vm1, %v481_v15, 0.0 }
 0x189   : > { %v979_v13 = vsub.f32 %v428_v41, %v466_v9  ;;  %497 = vadd.xlane.f32.xlu0 %v496_v11  ;;  %v487_v14 = vsel %vm434_vm1, %v477_v10, 0.0  ;;  %v752_v41 = vld [vmem:[%s1044_s4] ss:$0 sm:$0xff] }
 0x18a   : > { %488 = vadd.xlane.f32.xlu1 %v487_v14  ;;  %v483_v19 = vmul.f32 %v977_v12, %v977_v12 }
 0x18b   : > { %v482_v16 = vmul.f32 %v979_v13, %v979_v13 }
 0x18c   : > { %v505_v20 = vsel %vm434_vm1, %v483_v19, 0.0 }
 0x18d   : > { %v502_v18 = vsel %vm434_vm1, %v482_v16, 0.0 }
 0x18e   : > { %500 = vadd.xlane.f32.xlu1 %v499_v17  ;;  %503 = vadd.xlane.f32.xlu0 %v502_v18 }
 0x192   : > { %506 = vadd.xlane.f32.xlu1 %v505_v20 }
 0x20e   : > { %v492_v21 = vpop.xlane.xlu0 %491 }
 0x20f   : > { %v510_v22 = vmul.f32 0.03125, %v492_v21 }
 0x211   : > { %v518_v23 = vadd.f32 1e-05, %v510_v22 }
 0x212   : > { %v495_v24 = vpop.xlane.xlu1 %494  ;;  %v486_v25 = vpop.xlane.xlu0 %485 }
 0x213   : > { %817 = vrsqrt.f32 %v518_v23  ;;  %v511_v26 = vmul.f32 0.03125, %v495_v24  ;;  %v508_v27 = vmul.f32 0.03125, %v486_v25 }
 0x215   : > { %v519_v28 = vadd.f32 1e-05, %v511_v26  ;;  %v516_v29 = vadd.f32 1e-05, %v508_v27 }
 0x216   : > { %v498_v30 = vpop.xlane.xlu0 %497 }
 0x217   : > { %819 = vrsqrt.f32 %v519_v28  ;;  %v512_v31 = vmul.f32 0.03125, %v498_v30  ;;  %v489_v32 = vpop.xlane.xlu1 %488 }
 0x218   : > { %821 = vrsqrt.f32 %v516_v29  ;;  %v509_v33 = vmul.f32 0.03125, %v489_v32 }
 0x219   : > { %v520_v34 = vadd.f32 1e-05, %v512_v31 }
 0x21a   : > { %v517_v35 = vadd.f32 1e-05, %v509_v33 }
 0x21b   : > { %823 = vrsqrt.f32 %v520_v34  ;;  %v501_v36 = vpop.xlane.xlu1 %500  ;;  %v504_v37 = vpop.xlane.xlu0 %503 }
 0x21c   : > { %825 = vrsqrt.f32 %v517_v35  ;;  %v513_v38 = vmul.f32 0.03125, %v501_v36  ;;  %v514_v39 = vmul.f32 0.03125, %v504_v37 }
 0x21d   : > { %v818_v40 = vpop.eup %817 }
 0x21e   : > { %v534_v42 = vmul.f32 %v818_v40, %v951_v49  ;;  %v521_v43 = vadd.f32 1e-05, %v513_v38  ;;  %v522_v44 = vadd.f32 1e-05, %v514_v39 }
 0x21f   : > { %v507_v46 = vpop.xlane.xlu1 %506 }
 0x220   : > { %v549_v47 = vmul.f32 %v752_v41, %v534_v42  ;;  %827 = vrsqrt.f32 %v521_v43  ;;  %v515_v48 = vmul.f32 0.03125, %v507_v46 }
 0x221   : > { %v820_v51 = vpop.eup %819  ;;  %829 = vrsqrt.f32 %v522_v44 }
 0x222   : > { %v822_v53 = vpop.eup %821  ;;  %v564_v54 = vadd.f32 %v753_v45, %v549_v47  ;;  %v535_v55 = vmul.f32 %v820_v51, %v957_v56  ;;  %v523_v57 = vadd.f32 1e-05, %v515_v48 }
 0x223   : > { %v532_v49 = vmul.f32 %v822_v53, %v953_v50 }
 0x224   : > { %v579_v58 = vadd.f32 %v754_v52, %v564_v54  ;;  %v550_v60 = vmul.f32 %v752_v41, %v535_v55  ;;  %831 = vrsqrt.f32 %v523_v57 }
 0x225   : > { %v824_v61 = vpop.eup %823  ;;  %v547_v62 = vmul.f32 %v752_v41, %v532_v49 }
 0x226   : > { %v826_v63 = vpop.eup %825  ;;  %v769_v0 = vpack.c.bf16 %v579_v58, %v579_v58  ;;  %v565_v1 = vadd.f32 %v753_v45, %v550_v60  ;;  %v536_v56 = vmul.f32 %v824_v61, %v962_v59 }
 0x227   : > { %v562_v2 = vadd.f32 %v753_v45, %v547_v62  ;;  %v533_v50 = vmul.f32 %v826_v63, %v972_v5 }
 0x228   : > { %620 = vst.msk [vmem:[%s1008_s13 + $0x8] sm:$0xf] %vm617_vm2, %v769_v0  ;;  %v580_v3 = vadd.f32 %v754_v52, %v565_v1  ;;  %v551_v6 = vmul.f32 %v752_v41, %v536_v56 }
 0x229   : > { %v577_v7 = vadd.f32 %v754_v52, %v562_v2  ;;  %v548_v8 = vmul.f32 %v752_v41, %v533_v50 }
 0x22a   : > { %v828_v9 = vpop.eup %827  ;;  %v770_v10 = vpack.c.bf16 %v580_v3, %v580_v3  ;;  %v566_v11 = vadd.f32 %v753_v45, %v551_v6 }
 0x22b   : > { %v830_v14 = vpop.eup %829  ;;  %v767_v15 = vpack.c.bf16 %v577_v7, %v577_v7  ;;  %v563_v16 = vadd.f32 %v753_v45, %v548_v8  ;;  %v537_v59 = vmul.f32 %v828_v9, %v970_v4 }
 0x22c   : > { %621 = vst.msk [vmem:[%s1008_s13 + $0xc] sm:$0xf] %vm617_vm2, %v770_v10  ;;  %v581_v5 = vadd.f32 %v754_v52, %v566_v11  ;;  %v538_v17 = vmul.f32 %v830_v14, %v979_v13 }
 0x22d   : > { %618 = vst.msk [vmem:[%s1008_s13] sm:$0xf] %vm617_vm2, %v767_v15  ;;  %v578_v18 = vadd.f32 %v754_v52, %v563_v16  ;;  %v552_v19 = vmul.f32 %v752_v41, %v537_v59 }
 0x22e   : > { %v832_v20 = vpop.eup %831  ;;  %v771_v21 = vpack.c.bf16 %v581_v5, %v581_v5  ;;  %v553_v22 = vmul.f32 %v752_v41, %v538_v17 }
 0x22f   : > { %v768_v23 = vpack.c.bf16 %v578_v18, %v578_v18  ;;  %v567_v24 = vadd.f32 %v753_v45, %v552_v19  ;;  %v539_v25 = vmul.f32 %v832_v20, %v977_v12 }
 0x230   : > { %622 = vst.msk [vmem:[%s1008_s13 + $0x10] sm:$0xf] %vm617_vm2, %v771_v21  ;;  %v568_v4 = vadd.f32 %v753_v45, %v553_v22 }
 0x231   : > { %619 = vst.msk [vmem:[%s1008_s13 + $0x4] sm:$0xf] %vm617_vm2, %v768_v23  ;;  %v582_v13 = vadd.f32 %v754_v52, %v567_v24  ;;  %v554_v26 = vmul.f32 %v752_v41, %v539_v25 }
 0x232   : > { %v583_v27 = vadd.f32 %v754_v52, %v568_v4 }
 0x233   : > { %v772_v28 = vpack.c.bf16 %v582_v13, %v582_v13  ;;  %v569_v29 = vadd.f32 %v753_v45, %v554_v26 }
 0x234   : > { %v773_v30 = vpack.c.bf16 %v583_v27, %v583_v27 }
 0x235   : > { %623 = vst.msk [vmem:[%s1008_s13 + $0x14] sm:$0xf] %vm617_vm2, %v772_v28  ;;  %v584_v31 = vadd.f32 %v754_v52, %v569_v29 }
 0x236   : > { %624 = vst.msk [vmem:[%s1008_s13 + $0x18] sm:$0xf] %vm617_vm2, %v773_v30 }
 0x237   : > { %v774_v32 = vpack.c.bf16 %v584_v31, %v584_v31 }
 0x239   : > { %625 = vst.msk [vmem:[%s1008_s13 + $0x1c] sm:$0xf] %vm617_vm2, %v774_v32 }
 0x23a PF: > { %s16_s23 = sadd.s32 1, %s855_s23   ;;  %s1047_s21 = smov %s851_s22 }
 0x23b   : > { %p13_p5 = scmp.ge.s32.totalorder %s16_s23, 4   ;;  %s1048_s22 = smov %s1050_s24 }
 0x23d   :  { %15 = sbr.rel (!%p13_p5) target bundleno = 2 (0x2), region = 80 }

</bundles_post_ra>
